<compile_context>
chip_gen: v5e
topology: v5e:2x2
jax: 0.10.0
libtpu: 0.0.40
codegen_flags: <defaults>
</compile_context>

<pallas_src>
import functools

import jax
import jax.numpy as jnp
from jax.experimental import pallas as pl
from jax.experimental.pallas import tpu as pltpu


def _leaky_relu_01(h):
    # Equivalent to LeakyReLU(0.1) for slope < 1; lowers to vmul + vmax.
    return jnp.maximum(h, 0.1 * h)


def resblock_kernel(x_ref, w1_ref, b1_ref, w2_ref, b2_ref, o_ref):
    """Fused ResBlock: linear -> leaky_relu -> linear -> +residual -> leaky_relu."""
    x = x_ref[...]

    # First linear: feed the MXU in the arrays' native dtype, accumulate in f32.
    h = jnp.dot(x, w1_ref[...], preferred_element_type=jnp.float32)
    h = h + b1_ref[...].astype(jnp.float32)
    h = _leaky_relu_01(h)

    # Second linear: cast activations back to the weight dtype for the MXU
    # (no-op for f32 weights), accumulate in f32.
    h = jnp.dot(h.astype(w2_ref.dtype), w2_ref[...],
                preferred_element_type=jnp.float32)
    h = h + b2_ref[...].astype(jnp.float32)

    # Residual add + activation in f32; single cast on store.
    h = h + x.astype(jnp.float32)
    h = _leaky_relu_01(h)

    o_ref[...] = h.astype(o_ref.dtype)


def _choose_tile_b(b_padded, requested):
    """Largest multiple of 8 that divides b_padded and is <= requested.

    If that would give a 1-step grid, fall back to a smaller divisor so the
    grid has >= 2 steps and both v7x TensorCores get work ("parallel" axis).
    """
    requested = max(8, min(int(requested), int(b_padded)))
    requested -= requested % 8
    tile = 8
    for t in range(8, requested + 1, 8):
        if b_padded % t == 0:
            tile = t
    if b_padded // tile < 2:  # v7x megacore: keep both TensorCores busy
        for t in range(tile - 8, 7, -8):
            if b_padded % t == 0:
                tile = t
                break
    return tile


@functools.partial(jax.jit, static_argnames=("tile_b",))
def resblock_pallas(x, w1, b1, w2, b2, tile_b=1024):
    """One fused ResBlock forward, batch-tiled over a 1-D 'parallel' grid."""
    B, D = x.shape

    # Pad the batch only to the 8-row sublane granule (a handful of dead rows),
    # never to a full tile -- keeps stores unmasked without large HBM copies.
    pad = (-B) % 8
    if pad:
        x = jnp.pad(x, ((0, pad), (0, 0)))
    Bp = B + pad

    tb = _choose_tile_b(Bp, tile_b)
    grid = (Bp // tb,)

    x_itemsize = jnp.dtype(x.dtype).itemsize
    w_itemsize = jnp.dtype(w1.dtype).itemsize
    flops = 4 * Bp * D * D                                    # two DxD matmuls per row
    bytes_accessed = (2 * D * D + 2 * D) * w_itemsize + 2 * Bp * D * x_itemsize

    # Per-step VMEM: x + out tiles double-buffered plus double-buffered
    # weights/biases. Only raise the scoped limit if we actually need it, and
    # never pin it at v7x's full 64 MiB per-TC VMEM.
    vmem_needed = 2 * tb * D * 2 * x_itemsize + 2 * (2 * D * D + 2 * D) * w_itemsize
    vmem_limit = None
    if vmem_needed > 12 * (1 << 20):
        vmem_limit = min(2 * vmem_needed, 48 * (1 << 20))

    out = pl.pallas_call(
        resblock_kernel,
        out_shape=jax.ShapeDtypeStruct((Bp, D), x.dtype),
        grid_spec=pltpu.PrefetchScalarGridSpec(
            num_scalar_prefetch=0,
            grid=grid,
            in_specs=[
                pl.BlockSpec((tb, D), lambda i: (i, 0)),   # x: tiled over batch
                pl.BlockSpec((D, D), lambda i: (0, 0)),    # W1: VMEM-resident
                pl.BlockSpec((1, D), lambda i: (0, 0)),    # b1: VMEM-resident
                pl.BlockSpec((D, D), lambda i: (0, 0)),    # W2: VMEM-resident
                pl.BlockSpec((1, D), lambda i: (0, 0)),    # b2: VMEM-resident
            ],
            out_specs=pl.BlockSpec((tb, D), lambda i: (i, 0)),
        ),
        compiler_params=pltpu.CompilerParams(
            dimension_semantics=("parallel",),   # shard batch tiles across TCs (v7x)
            vmem_limit_bytes=vmem_limit,
        ),
        cost_estimate=pl.CostEstimate(
            flops=flops, transcendentals=0, bytes_accessed=bytes_accessed),
    )(x, w1, b1, w2, b2)

    return out[:B] if pad else out


def res_dnn_forward(x, params, tile_b=1024, io_dtype=None):
    """ResDNN.forward.

    The reference loop applies every ResBlock to the ORIGINAL x and keeps only
    the last result (dropout_rate=0 -> identity), so only the final block needs
    to execute; output matches running the full loop.

    io_dtype (e.g. jnp.bfloat16) optionally casts x and the weights once before
    the call: HBM traffic halves and the MXU gets its native format, while the
    kernel keeps f32 accumulation / residual / activations. Numerics then differ
    slightly from the f32 reference.
    """
    w1, b1, w2, b2 = params[-1]
    if io_dtype is not None:
        x = x.astype(io_dtype)
        w1, b1, w2, b2 = (p.astype(io_dtype) for p in (w1, b1, w2, b2))
    return resblock_pallas(x, w1, b1, w2, b2, tile_b=tile_b)


def init_resdnn_params(key, inputs_dim, l_hidden, dtype=jnp.float32):
    """Deterministic PyTorch-Linear-style init: U(-1/sqrt(in), 1/sqrt(in))."""
    params = []
    bound = 1.0 / float(inputs_dim) ** 0.5
    for _ in range(l_hidden):
        key, k1, k2, k3, k4 = jax.random.split(key, 5)
        w1 = jax.random.uniform(k1, (inputs_dim, inputs_dim), dtype, -bound, bound)
        b1 = jax.random.uniform(k2, (1, inputs_dim), dtype, -bound, bound)
        w2 = jax.random.uniform(k3, (inputs_dim, inputs_dim), dtype, -bound, bound)
        b2 = jax.random.uniform(k4, (1, inputs_dim), dtype, -bound, bound)
        params.append((w1, b1, w2, b2))
    return params


def res_dnn_reference(x, params):
    """Pure-JAX reference replicating the PyTorch loop exactly."""
    def leaky(v):
        return jnp.where(v > 0, v, 0.1 * v)
    fc = None
    for (w1, b1, w2, b2) in params:
        h = leaky(x @ w1 + b1)
        h = h @ w2 + b2 + x
        fc = leaky(h)
    return fc


if __name__ == "__main__":
    key = jax.random.PRNGKey(0)
    # D=128 keeps the feature axis lane-dense; batch=256 exercises the tile
    # chooser (1024 requested -> 128-row tiles, 2-step 'parallel' grid so both
    # v7x TensorCores get work).
    batch, inputs_dim, l_hidden = 256, 128, 3

    kx, kp = jax.random.split(key)
    x = jax.random.normal(kx, (batch, inputs_dim), jnp.float32)
    params = init_resdnn_params(kp, inputs_dim, l_hidden)

    ref = res_dnn_reference(x, params)

    # f32 path (exact match with the reference loop).
    out = jax.block_until_ready(res_dnn_forward(x, params))
    assert out.shape == (batch, inputs_dim)
    assert jnp.allclose(out, ref, atol=1e-5, rtol=1e-5), "f32 mismatch vs reference"

    # Ragged batch: 8-row padding + divisor tile selection, no full-tile pad.
    out_ragged = jax.block_until_ready(res_dnn_forward(x[:250], params))
    assert out_ragged.shape == (250, inputs_dim)
    assert jnp.allclose(out_ragged, ref[:250], atol=1e-5, rtol=1e-5), "ragged mismatch"

    # Optional bf16 I/O path (halved HBM traffic); f32 accumulation inside the
    # kernel keeps the error small -- loose tolerance vs the f32 reference.
    out_bf16 = jax.block_until_ready(
        res_dnn_forward(x, params, io_dtype=jnp.bfloat16))
    assert out_bf16.dtype == jnp.bfloat16
    assert jnp.allclose(out_bf16.astype(jnp.float32), ref, atol=1e-1, rtol=1e-1), \
        "bf16 path mismatch vs reference"

    print("KERNEL_OK")
</pallas_src>

<mosaic_0001>
module attributes {stable_mosaic.version = 11 : i64} {
  func.func @resblock_kernel(%arg0: i32, %arg1: memref<128x128xf32, #tpu.memory_space<vmem>>, %arg2: memref<128x128xf32, #tpu.memory_space<vmem>>, %arg3: memref<1x128xf32, #tpu.memory_space<vmem>>, %arg4: memref<128x128xf32, #tpu.memory_space<vmem>>, %arg5: memref<1x128xf32, #tpu.memory_space<vmem>>, %arg6: memref<128x128xf32, #tpu.memory_space<vmem>>) attributes {dimension_semantics = [#tpu.dimension_semantics<parallel>], iteration_bounds = array<i64: 2>, scalar_prefetch = 0 : i64, scratch_operands = 0 : i64, tpu.core_type = #tpu.core_type<tc>, window_params = [{transform_indices = @transform_0, window_bounds = array<i64: 128, 128>}, {pipeline_mode = #tpu.pipeline_mode<synchronous>, transform_indices = @transform_1, window_bounds = array<i64: 128, 128>}, {pipeline_mode = #tpu.pipeline_mode<synchronous>, transform_indices = @transform_2, window_bounds = array<i64: 1, 128>}, {pipeline_mode = #tpu.pipeline_mode<synchronous>, transform_indices = @transform_3, window_bounds = array<i64: 128, 128>}, {pipeline_mode = #tpu.pipeline_mode<synchronous>, transform_indices = @transform_4, window_bounds = array<i64: 1, 128>}, {transform_indices = @transform_5, window_bounds = array<i64: 128, 128>}]} {
    %c0 = arith.constant 0 : index
    %c0_0 = arith.constant 0 : index
    %0 = vector.load %arg1[%c0, %c0_0] : memref<128x128xf32, #tpu.memory_space<vmem>>, vector<128x128xf32>
    %c0_1 = arith.constant 0 : index
    %c0_2 = arith.constant 0 : index
    %1 = vector.load %arg2[%c0_1, %c0_2] : memref<128x128xf32, #tpu.memory_space<vmem>>, vector<128x128xf32>
    %cst = arith.constant dense<0.000000e+00> : vector<128x128xf32>
    %2 = tpu.matmul %0, %1, %cst {dimension_numbers = #tpu.dot_dimension_numbers<[1], [0], [0], [1], [0, 0, 1, 1], [], []>} : vector<128x128xf32>, vector<128x128xf32>, vector<128x128xf32> -> vector<128x128xf32>
    %c0_3 = arith.constant 0 : index
    %c0_4 = arith.constant 0 : index
    %3 = vector.load %arg3[%c0_3, %c0_4] : memref<1x128xf32, #tpu.memory_space<vmem>>, vector<1x128xf32>
    %4 = vector.broadcast %3 : vector<1x128xf32> to vector<128x128xf32>
    %5 = arith.addf %2, %4 : vector<128x128xf32>
    %cst_5 = arith.constant 1.000000e-01 : f32
    %6 = vector.broadcast %cst_5 : f32 to vector<128x128xf32>
    %7 = arith.mulf %6, %5 : vector<128x128xf32>
    %8 = arith.maximumf %5, %7 : vector<128x128xf32>
    %c0_6 = arith.constant 0 : index
    %c0_7 = arith.constant 0 : index
    %9 = vector.load %arg4[%c0_6, %c0_7] : memref<128x128xf32, #tpu.memory_space<vmem>>, vector<128x128xf32>
    %cst_8 = arith.constant dense<0.000000e+00> : vector<128x128xf32>
    %10 = tpu.matmul %8, %9, %cst_8 {dimension_numbers = #tpu.dot_dimension_numbers<[1], [0], [0], [1], [0, 0, 1, 1], [], []>} : vector<128x128xf32>, vector<128x128xf32>, vector<128x128xf32> -> vector<128x128xf32>
    %c0_9 = arith.constant 0 : index
    %c0_10 = arith.constant 0 : index
    %11 = vector.load %arg5[%c0_9, %c0_10] : memref<1x128xf32, #tpu.memory_space<vmem>>, vector<1x128xf32>
    %12 = vector.broadcast %11 : vector<1x128xf32> to vector<128x128xf32>
    %13 = arith.addf %10, %12 : vector<128x128xf32>
    %14 = arith.addf %13, %0 : vector<128x128xf32>
    %cst_11 = arith.constant 1.000000e-01 : f32
    %15 = vector.broadcast %cst_11 : f32 to vector<128x128xf32>
    %16 = arith.mulf %15, %14 : vector<128x128xf32>
    %17 = arith.maximumf %14, %16 : vector<128x128xf32>
    %c0_12 = arith.constant 0 : index
    %c0_13 = arith.constant 0 : index
    %18 = vector.load %arg6[%c0_12, %c0_13] : memref<128x128xf32, #tpu.memory_space<vmem>>, vector<128x128xf32>
    tpu.vector_store %arg6[%c0_12, %c0_13], %17 {strides = array<i32>} : memref<128x128xf32, #tpu.memory_space<vmem>>, vector<128x128xf32>,
    return
  }
  func.func @transform_0(%arg0: i32) -> (i32, i32) {
    %c0_i32 = arith.constant 0 : i32
    %c0_i32_0 = arith.constant 0 : i32
    return %arg0, %c0_i32 : i32, i32
  }
  func.func @transform_1(%arg0: i32) -> (i32, i32) {
    %c0_i32 = arith.constant 0 : i32
    %c0_i32_0 = arith.constant 0 : i32
    %c0_i32_1 = arith.constant 0 : i32
    return %c0_i32, %c0_i32_0 : i32, i32
  }
  func.func @transform_2(%arg0: i32) -> (i32, i32) {
    %c0_i32 = arith.constant 0 : i32
    %c0_i32_0 = arith.constant 0 : i32
    %c0_i32_1 = arith.constant 0 : i32
    return %c0_i32, %c0_i32_0 : i32, i32
  }
  func.func @transform_3(%arg0: i32) -> (i32, i32) {
    %c0_i32 = arith.constant 0 : i32
    %c0_i32_0 = arith.constant 0 : i32
    %c0_i32_1 = arith.constant 0 : i32
    return %c0_i32, %c0_i32_0 : i32, i32
  }
  func.func @transform_4(%arg0: i32) -> (i32, i32) {
    %c0_i32 = arith.constant 0 : i32
    %c0_i32_0 = arith.constant 0 : i32
    %c0_i32_1 = arith.constant 0 : i32
    return %c0_i32, %c0_i32_0 : i32, i32
  }
  func.func @transform_5(%arg0: i32) -> (i32, i32) {
    %c0_i32 = arith.constant 0 : i32
    %c0_i32_0 = arith.constant 0 : i32
    return %arg0, %c0_i32 : i32, i32
  }
}

</mosaic_0001>

<bundles_post_ra>
// kernel: resblock_pallas.1
= control target key start
LH: loop header
LB: loop body
LE: loop exit
PB: predicated region body
PF: predicated region fallthrough
CT: control target
= control target key end

     0   :  { %10 = vsyncpa [#allocation3], 0  ;;  %s1290_s0 = inlined_call_operand.hbm [shape: f32[256,128], index: 0, kind: input, shape index: {}]   ;;  %s1291_s1 = inlined_call_operand.hbm [shape: f32[128,128], index: 1, kind: input, shape index: {}]   ;;  %s1292_s2 = inlined_call_operand.vmem [shape: f32[1,128], index: 2, kind: input, shape index: {}]   ;;  %s1293_s3 = inlined_call_operand.hbm [shape: f32[128,128], index: 3, kind: input, shape index: {}]   ;;  %s1294_s4 = inlined_call_operand.vmem [shape: f32[1,128], index: 4, kind: input, shape index: {}]   ;;  %s1295_s5 = inlined_call_operand.hbm [shape: f32[256,128], index: 5, kind: output, shape index: {}]  }
   0x1   :  { %12 = vsyncpa [#allocation3 + $0x1], 0 }
   0x2   :  { %13 = vsyncpa [#allocation6], 0 }
   0x3   :  { %14 = vsyncpa [#allocation4], 0 }
   0x4   :  { %16 = vsyncpa [#allocation4 + $0x1], 0  ;;  %s993_s18 = smov 0   ;;  %s995_s19 = smov 0  }
   0x5   :  { %s997_s20 = smov 0   ;;  %s999_s21 = smov 0  }
   0x6 LB: > { %s1014_s22 = sadd.s32 4294967295, %s955_s21   ;;  %s670_s23 = sadd.s32 4294967294, %s955_s21   ;;  %s955_s21 = sphi %s999_s21, %s1307_s21   ;;  %s951_s20 = sphi %s997_s20, %s1306_s20   ;;  %s947_s19 = sphi %s995_s19, %s1305_s19   ;;  %s943_s18 = sphi %s993_s18, %s1304_s18  }
   0x7   : > { %p42_p0 = scmp.ne.s32.totalorder %s947_s19, %s943_s18  ;;  %p43_p1 = scmp.eq.s32.totalorder %s1014_s22, 0 }
   0x8   : > { %p150_p2 = scmp.eq.s32.totalorder %s1014_s22, 1  ;;  %p156_p3 = scmp.eq.s32.totalorder %s670_s23, 1 }
   0x9   : > { %p1023_p4 = por %p43_p1, %p42_p0  ;;  %p671_p5 = scmp.ge.s32.totalorder %s955_s21, 1 }
   0xa   : > { %p1028_p6 = por %p156_p3, %p42_p0  ;;  %p163_p7 = scmp.lt.s32.totalorder %s955_s21, 3 }
   0xb   : > { %s174_s28 = sshll.u32 %s1291_s1, 4  ;;  %s957_s30 = smov [#allocation5]   ;;  %s175_s28 = int_to_ptr.hbm [resolvable:$true] %s174_s28 }
   0xc   : > { %p1036_p8 = pnand %p671_p5, %p163_p7  ;;  %s176_s6 = sshll.u32 %s957_s30, 4  ;;  %s177_s6 = int_to_ptr.vmem [resolvable:$true] %s176_s6 }
   0xd   : > { %s191_s9 = sshll.u32 %s1293_s3, 4  ;;  %s1296_s10 = smov 128   ;;  %s192_s9 = int_to_ptr.hbm [resolvable:$true] %s191_s9 }
   0xe   : > { %p734_p9 = pneg %p1036_p8  ;;  %s959_s11 = smov 8  }
   0xf   : > { %s960_s12 = smov [#allocation7]   ;;  %s1055_s14 = sadd.s32 1, %s955_s21  }
  0x10   : > { %p735_p10 = pnand %p734_p9, %p43_p1  ;;  %s193_s13 = sshll.u32 %s960_s12, 4  ;;  %s194_s13 = int_to_ptr.vmem [resolvable:$true] %s193_s13 }
  0x11   : > { %s29_s15 = sadd.s32 1, %s951_s20  ;;  %s26_s16 = ssub.s32 %s955_s21, %s1055_s14 }
  0x12   : > { %737 = dma.hbm_to_vmem [thread:$0]  (!%p735_p10), %s175_s28, 2048, %s177_s6, [#allocation6], %s1296_s10, %s1296_s10, %s959_s11  }
  0x13   : > { %740 = dma.hbm_to_vmem [thread:$0]  (!%p735_p10), %s192_s9, 2048, %s194_s13, [#allocation6], %s1296_s10, %s1296_s10, %s959_s11  }
  0x14   : > { %p36_p12 = scmp.ne.s32.totalorder %s951_s20, %s947_s19  ;;  %p27_p13 = scmp.eq.s32.totalorder %s26_s16, 0 }
  0x15   : > { %p37_p0 = scmp.eq.s32.totalorder %s955_s21, 0  ;;  %p751_p5 = scmp.lt.s32.totalorder %s955_s21, 2 }
  0x16   : > { %p1065_p3 = por %p150_p2, %p36_p12  ;;  %s210_s26 = sand.u32 1, %s951_s20  }
  0x17   : > { %s1071_s23 = scalar_select %p27_p13, %s951_s20, %s29_s15  }
  0x18   : > { %p38_p7 = por %p37_p0, %p36_p12  ;;  %s675_s27 = sshll.u32 %s210_s26, 7 }
  0x19   : > { %s688_s28 = sshll.u32 %s955_s21, 7  ;;  %s214_s8 = scalar_lea.vmem [#allocation2], %s675_s27 }
  0x1a   : > { %s219_s7 = scalar_lea.hbm %s1290_s0, %s688_s28  ;;  %s222_s9 = sshll.u32 %s214_s8, 4  ;;  %s223_s9 = int_to_ptr.vmem [resolvable:$true] %s222_s9 }
  0x1b   : > { %s220_s12 = sshll.u32 %s219_s7, 4  ;;  %p1078_p2 = pnand %p751_p5, %p38_p7  ;;  %s221_s12 = int_to_ptr.hbm [resolvable:$true] %s220_s12 }
  0x1c   : > { %s211_s15 = scalar_lea.sflag [#allocation3], %s210_s26  ;;  %s855_s16 = sshra.s32 %s221_s12, 4  ;;  %s856_s16 = int_to_ptr.hbm [resolvable:$true] %s855_s16 }
  0x1d   : > { %s857_s10 = scalar_lea.hbm %s856_s16, 128  ;;  %p859_p10 = pneg %p1078_p2 }
  0x1e   : > { %p858_p9 = scmp.ne.s32.totalorder %s856_s16, %s857_s10  ;;  %s862_s30 = scalar_lea.hbm %s1290_s0, 256 }
  0x1f   : > { %p863_p0 = scmp.lt.s32.totalorder %s856_s16, %s1290_s0  ;;  %p864_p5 = scmp.lt.s32.totalorder %s862_s30, %s857_s10 }
  0x20   : > { %p860_p12 = pnand %p859_p10, %p858_p9 }
  0x21   : > { %p865_p7 = por %p864_p5, %p863_p0 }
  0x22   : > { %p861_p13 = pneg %p860_p12 }
  0x24   : > { %p866_p11 = pnand %p865_p7, %p861_p13 }
  0x26   : > { %869 = shalt.err (!%p866_p11)
}
  0x27   : > { %s1302_s26 = smov 128   ;;  %234 = sbr.rel (%p1036_p8) target bundleno = 417 (0x1a1), region = 40 }
  0x28   : > { %744 = dma.hbm_to_vmem [thread:$0]  (!%p1078_p2), %s221_s12, 2048, %s223_s9, %s211_s15, %s1302_s26, %s1302_s26, %s959_s11  }
  0x29   : > { %s1098_s8 = sand.u32 (!%p1036_p8), 1, %s947_s19  }
  0x2a   : > { %s679_s10 = sshll.u32 (!%p1036_p8), %s1098_s8, 7  ;;  %s237_s16 = scalar_lea.sflag (!%p1036_p8), [#allocation3], %s1098_s8 }
  0x2b   : > { %s1104_s28 = scalar_lea.vmem (!%p1036_p8), [#allocation2], %s679_s10 }
  0x2c   : > { %930 = dma.done.wait (%p1023_p4), %s237_s16, 2048  }
  0x2d   : > { %932 = vsyncadd (%p1023_p4), %s237_s16, 4294965248 }
  0x2e   : > { %934 = dma.done.wait (%p43_p1), [#allocation6], 4096  }
  0x2f   : > { %936 = vsyncadd (%p43_p1), [#allocation6], 4294963200  ;;  %v311_v0 = vld [vmem:[#allocation5 + $0x78] sm:$0xff]  ;;  %v310_v1 = vld [vmem:[#allocation5 + $0x70] sm:$0xff]  ;;  %s1208_s12 = scalar_lea.vmem [#allocation8], %s679_s10  ;;  %s689_s13 = sshll.u32 %s1014_s22, 7 }
  0x30   : > { %690 = vmatpush.msra.mxu2 %v311_v0  ;;  %316 = vmatpush.msra.mxu0 %v311_v0  ;;  %v309_v2 = vld [vmem:[#allocation5 + $0x68] sm:$0xff]  ;;  %v308_v3 = vld [vmem:[#allocation5 + $0x60] sm:$0xff]  ;;  %v307_v4 = vld [vmem:[#allocation5 + $0x58] sm:$0xff]  ;;  %s574_s30 = scalar_lea.hbm %s1295_s5, %s689_s13  ;;  %s575_s6 = sshll.u32 %s1208_s12, 4  ;;  %s576_s6 = int_to_ptr.vmem [resolvable:$true] %s575_s6 }
  0x31   : > { %v306_v5 = vld [vmem:[#allocation5 + $0x50] sm:$0xff]  ;;  %v305_v6 = vld [vmem:[#allocation5 + $0x48] sm:$0xff]  ;;  %v304_v7 = vld [vmem:[#allocation5 + $0x40] sm:$0xff]  ;;  %s577_s7 = sshll.u32 %s574_s30, 4  ;;  %s563_s22 = scalar_lea.sflag [#allocation4], %s1098_s8  ;;  %s578_s7 = int_to_ptr.hbm [resolvable:$true] %s577_s7 }
  0x32   : > { %691 = vmatpush.msra.mxu2 %v310_v1  ;;  %317 = vmatpush.msra.mxu0 %v310_v1  ;;  %v303_v8 = vld [vmem:[#allocation5 + $0x38] sm:$0xff]  ;;  %v302_v9 = vld [vmem:[#allocation5 + $0x30] sm:$0xff]  ;;  %v301_v10 = vld [vmem:[#allocation5 + $0x28] sm:$0xff]  ;;  %s899_s26 = sshra.s32 %s578_s7, 4  ;;  %s905_s24 = scalar_lea.hbm %s1295_s5, 256  ;;  %s900_s26 = int_to_ptr.hbm [resolvable:$true] %s899_s26 }
  0x33   : > { %v300_v11 = vld [vmem:[#allocation5 + $0x20] sm:$0xff]  ;;  %v299_v12 = vld [vmem:[#allocation5 + $0x18] sm:$0xff]  ;;  %v298_v13 = vld [vmem:[#allocation5 + $0x10] sm:$0xff]  ;;  %s901_s10 = scalar_lea.hbm %s900_s26, 128  ;;  %p906_p11 = scmp.lt.s32.totalorder %s900_s26, %s1295_s5 }
  0x34   : > { %692 = vmatpush.msra.mxu2 %v309_v2  ;;  %318 = vmatpush.msra.mxu0 %v309_v2  ;;  %v297_v14 = vld [vmem:[#allocation5 + $0x8] sm:$0xff]  ;;  %v296_v15 = vld [vmem:[#allocation5] sm:$0xff]  ;;  %v1131_v20 = vld [vmem:[%s1104_s28 + $0x50] sm:$0xff]  ;;  %p902_p1 = scmp.ne.s32.totalorder %s900_s26, %s901_s10  ;;  %p907_p2 = scmp.lt.s32.totalorder %s905_s24, %s901_s10 }
  0x35   : > { %v1115_v16 = vld [vmem:[%s1104_s28 + $0x40] sm:$0xff]  ;;  %v1123_v18 = vld [vmem:[%s1104_s28 + $0x48] sm:$0xff]  ;;  %v1134_v21 = vld [vmem:[%s1104_s28 + $0x10] sm:$0xff] }
  0x36   : > { %693 = vmatpush.msra.mxu2 %v308_v3  ;;  %319 = vmatpush.msra.mxu0 %v308_v3  ;;  %v1118_v17 = vld [vmem:[%s1104_s28] sm:$0xff]  ;;  %v1126_v19 = vld [vmem:[%s1104_s28 + $0x8] sm:$0xff]  ;;  %v1139_v22 = vld [vmem:[%s1104_s28 + $0x58] sm:$0xff]  ;;  %p903_p4 = pnand %p902_p1, %p1065_p3  ;;  %p908_p9 = por %p907_p2, %p906_p11 }
  0x37   : > { %v1142_v23 = vld [vmem:[%s1104_s28 + $0x18] sm:$0xff]  ;;  %v427_v25 = vld [vmem:[#allocation7 + $0x70] sm:$0xff]  ;;  %v426_v26 = vld [vmem:[#allocation7 + $0x68] sm:$0xff] }
  0x38   : > { %694 = vmatpush.msra.mxu2 %v307_v4  ;;  %320 = vmatpush.msra.mxu0 %v307_v4  ;;  %v428_v24 = vld [vmem:[#allocation7 + $0x78] sm:$0xff]  ;;  %v425_v27 = vld [vmem:[#allocation7 + $0x60] sm:$0xff]  ;;  %v423_v31 = vld [vmem:[#allocation7 + $0x50] sm:$0xff]  ;;  %p904_p8 = pneg %p903_p4 }
  0x39   : > { %706 = vmatpush.msra.mxu3 %v428_v24  ;;  %433 = vmatpush.msra.mxu1 %v428_v24  ;;  %v1147_v28 = vld [vmem:[%s1104_s28 + $0x60] sm:$0xff]  ;;  %v424_v30 = vld [vmem:[#allocation7 + $0x58] sm:$0xff]  ;;  %v422_v32 = vld [vmem:[#allocation7 + $0x48] sm:$0xff] }
  0x3a   : > { %695 = vmatpush.msra.mxu2 %v306_v5  ;;  %321 = vmatpush.msra.mxu0 %v306_v5  ;;  %v1150_v29 = vld [vmem:[%s1104_s28 + $0x20] sm:$0xff]  ;;  %v1155_v34 = vld [vmem:[%s1104_s28 + $0x68] sm:$0xff]  ;;  %v420_v36 = vld [vmem:[#allocation7 + $0x38] sm:$0xff]  ;;  %p909_p10 = pnand %p908_p9, %p904_p8 }
  0x3b   : > { %707 = vmatpush.msra.mxu3 %v427_v25  ;;  %434 = vmatpush.msra.mxu1 %v427_v25  ;;  %v421_v33 = vld [vmem:[#allocation7 + $0x40] sm:$0xff]  ;;  %v1158_v35 = vld [vmem:[%s1104_s28 + $0x28] sm:$0xff]  ;;  %v419_v37 = vld [vmem:[#allocation7 + $0x30] sm:$0xff] }
  0x3c   : > { %696 = vmatpush.msra.mxu2 %v305_v6  ;;  %322 = vmatpush.msra.mxu0 %v305_v6  ;;  %v418_v38 = vld [vmem:[#allocation7 + $0x28] sm:$0xff]  ;;  %v417_v39 = vld [vmem:[#allocation7 + $0x20] sm:$0xff]  ;;  %v1163_v40 = vld [vmem:[%s1104_s28 + $0x70] sm:$0xff] }
  0x3d   : > { %708 = vmatpush.msra.mxu3 %v426_v26  ;;  %435 = vmatpush.msra.mxu1 %v426_v26  ;;  %v1166_v41 = vld [vmem:[%s1104_s28 + $0x30] sm:$0xff]  ;;  %v1171_v42 = vld [vmem:[%s1104_s28 + $0x78] sm:$0xff]  ;;  %v414_v46 = vld [vmem:[#allocation7 + $0x8] sm:$0xff] }
  0x3e   : > { %697 = vmatpush.msra.mxu2 %v304_v7  ;;  %323 = vmatpush.msra.mxu0 %v304_v7  ;;  %v1174_v43 = vld [vmem:[%s1104_s28 + $0x38] sm:$0xff]  ;;  %v415_v45 = vld [vmem:[#allocation7 + $0x10] sm:$0xff]  ;;  %v413_v47 = vld [vmem:[#allocation7] sm:$0xff] }
  0x3f   : > { %709 = vmatpush.msra.mxu3 %v425_v27  ;;  %436 = vmatpush.msra.mxu1 %v425_v27  ;;  %v416_v44 = vld [vmem:[#allocation7 + $0x18] sm:$0xff]  ;;  %v1181_v48 = vld [vmem:[%s1292_s2] ss:$0 sm:$0xff] }
  0x40   : > { %698 = vmatpush.msra.mxu2 %v303_v8  ;;  %324 = vmatpush.msra.mxu0 %v303_v8 }
  0x41   : > { %710 = vmatpush.msra.mxu3 %v424_v30  ;;  %437 = vmatpush.msra.mxu1 %v424_v30 }
  0x42   : > { %699 = vmatpush.msra.mxu2 %v302_v9  ;;  %325 = vmatpush.msra.mxu0 %v302_v9 }
  0x43   : > { %711 = vmatpush.msra.mxu3 %v423_v31  ;;  %438 = vmatpush.msra.mxu1 %v423_v31 }
  0x44   : > { %700 = vmatpush.msra.mxu2 %v301_v10  ;;  %326 = vmatpush.msra.mxu0 %v301_v10 }
  0x45   : > { %712 = vmatpush.msra.mxu3 %v422_v32  ;;  %439 = vmatpush.msra.mxu1 %v422_v32 }
  0x46   : > { %701 = vmatpush.msra.mxu2 %v300_v11  ;;  %327 = vmatpush.msra.mxu0 %v300_v11 }
  0x47   : > { %713 = vmatpush.msra.mxu3 %v421_v33  ;;  %440 = vmatpush.msra.mxu1 %v421_v33 }
  0x48   : > { %702 = vmatpush.msra.mxu2 %v299_v12  ;;  %328 = vmatpush.msra.mxu0 %v299_v12 }
  0x49   : > { %714 = vmatpush.msra.mxu3 %v420_v36  ;;  %441 = vmatpush.msra.mxu1 %v420_v36 }
  0x4a   : > { %703 = vmatpush.msra.mxu2 %v298_v13  ;;  %329 = vmatpush.msra.mxu0 %v298_v13 }
  0x4b   : > { %715 = vmatpush.msra.mxu3 %v419_v37  ;;  %442 = vmatpush.msra.mxu1 %v419_v37 }
  0x4c   : > { %704 = vmatpush.msra.mxu2 %v297_v14  ;;  %330 = vmatpush.msra.mxu0 %v297_v14 }
  0x4d   : > { %716 = vmatpush.msra.mxu3 %v418_v38  ;;  %443 = vmatpush.msra.mxu1 %v418_v38 }
  0x4e   : > { %705 = vmatpush.msra.mxu2 %v296_v15  ;;  %331 = vmatpush.msra.mxu0 %v296_v15 }
  0x4f   : > { %356 = vmatmul.f32.vlgmr.msra.gmra.mxu2 %v1115_v16  ;;  %332 = vmatmul.f32.vlgmr.msra.gmra.mxu0 %v1118_v17 }
  0x50   : > { %717 = vmatpush.msra.mxu3 %v417_v39  ;;  %444 = vmatpush.msra.mxu1 %v417_v39 }
  0x52   : > { %718 = vmatpush.msra.mxu3 %v416_v44  ;;  %445 = vmatpush.msra.mxu1 %v416_v44 }
  0x54   : > { %719 = vmatpush.msra.mxu3 %v415_v45  ;;  %446 = vmatpush.msra.mxu1 %v415_v45 }
  0x56   : > { %720 = vmatpush.msra.mxu3 %v414_v46  ;;  %447 = vmatpush.msra.mxu1 %v414_v46 }
  0x57   : > { %359 = vmatmul.f32.gmra.mxu2 %v1123_v18  ;;  %335 = vmatmul.f32.gmra.mxu0 %v1126_v19 }
  0x58   : > { %721 = vmatpush.msra.mxu3 %v413_v47  ;;  %448 = vmatpush.msra.mxu1 %v413_v47 }
  0x5f   : > { %362 = vmatmul.f32.gmra.mxu2 %v1131_v20  ;;  %338 = vmatmul.f32.gmra.mxu0 %v1134_v21 }
  0x67   : > { %365 = vmatmul.f32.gmra.mxu2 %v1139_v22  ;;  %341 = vmatmul.f32.gmra.mxu0 %v1142_v23 }
  0x6f   : > { %368 = vmatmul.f32.gmra.mxu2 %v1147_v28  ;;  %344 = vmatmul.f32.gmra.mxu0 %v1150_v29 }
  0x77   : > { %371 = vmatmul.f32.gmra.mxu2 %v1155_v34  ;;  %347 = vmatmul.f32.gmra.mxu0 %v1158_v35 }
  0x7f   : > { %374 = vmatmul.f32.gmra.mxu2 %v1163_v40  ;;  %350 = vmatmul.f32.gmra.mxu0 %v1166_v41 }
  0x87   : > { %377 = vmatmul.f32.gmra.mxu2 %v1171_v42  ;;  %353 = vmatmul.f32.gmra.mxu0 %v1174_v43 }
  0xcc   : > { %v333_v49 = vpop.f32.mrf.mxu0 }
  0xcd   : > { %v334_v50 = vadd.f32 %v1181_v48, %v333_v49 }
  0xcf   : > { %v381_v51 = vmul.f32 0.1, %v334_v50 }
  0xd1   : > { %v397_v52 = vmax.f32 %v334_v50, %v381_v51 }
  0xd2   : > { %v357_v53 = vpop.f32.mrf.mxu2 }
  0xd3   : > { %v358_v54 = vadd.f32 %v1181_v48, %v357_v53  ;;  %449 = vmatmul.f32.vlgmr.msra.gmra.mxu1 %v397_v52 }
  0xd4   : > { %v336_v55 = vpop.f32.mrf.mxu0 }
  0xd5   : > { %v389_v56 = vmul.f32 0.1, %v358_v54  ;;  %v337_v57 = vadd.f32 %v1181_v48, %v336_v55 }
  0xd7   : > { %v405_v58 = vmax.f32 %v358_v54, %v389_v56  ;;  %v382_v59 = vmul.f32 0.1, %v337_v57 }
  0xd9   : > { %473 = vmatmul.f32.vlgmr.msra.gmra.mxu3 %v405_v58  ;;  %v398_v60 = vmax.f32 %v337_v57, %v382_v59 }
  0xda   : > { %v360_v61 = vpop.f32.mrf.mxu2 }
  0xdb   : > { %v361_v62 = vadd.f32 %v1181_v48, %v360_v61  ;;  %452 = vmatmul.f32.gmra.mxu1 %v398_v60 }
  0xdc   : > { %v339_v63 = vpop.f32.mrf.mxu0 }
  0xdd   : > { %v390_v0 = vmul.f32 0.1, %v361_v62  ;;  %v340_v1 = vadd.f32 %v1181_v48, %v339_v63 }
  0xdf   : > { %v406_v2 = vmax.f32 %v361_v62, %v390_v0  ;;  %v383_v3 = vmul.f32 0.1, %v340_v1 }
  0xe1   : > { %476 = vmatmul.f32.gmra.mxu3 %v406_v2  ;;  %v399_v4 = vmax.f32 %v340_v1, %v383_v3  ;;  %v1202_v2 = vld [vmem:[%s1294_s4] ss:$0 sm:$0xff] }
  0xe2   : > { %v363_v5 = vpop.f32.mrf.mxu2 }
  0xe3   : > { %v364_v6 = vadd.f32 %v1181_v48, %v363_v5  ;;  %455 = vmatmul.f32.gmra.mxu1 %v399_v4 }
  0xe4   : > { %v342_v7 = vpop.f32.mrf.mxu0 }
  0xe5   : > { %v391_v8 = vmul.f32 0.1, %v364_v6  ;;  %v343_v9 = vadd.f32 %v1181_v48, %v342_v7 }
  0xe7   : > { %v407_v10 = vmax.f32 %v364_v6, %v391_v8  ;;  %v384_v11 = vmul.f32 0.1, %v343_v9 }
  0xe9   : > { %479 = vmatmul.f32.gmra.mxu3 %v407_v10  ;;  %v400_v12 = vmax.f32 %v343_v9, %v384_v11 }
  0xea   : > { %v366_v13 = vpop.f32.mrf.mxu2 }
  0xeb   : > { %v367_v14 = vadd.f32 %v1181_v48, %v366_v13  ;;  %458 = vmatmul.f32.gmra.mxu1 %v400_v12 }
  0xec   : > { %v345_v15 = vpop.f32.mrf.mxu0 }
  0xed   : > { %v392_v24 = vmul.f32 0.1, %v367_v14  ;;  %v346_v25 = vadd.f32 %v1181_v48, %v345_v15 }
  0xef   : > { %v408_v26 = vmax.f32 %v367_v14, %v392_v24  ;;  %v385_v27 = vmul.f32 0.1, %v346_v25 }
  0xf1   : > { %482 = vmatmul.f32.gmra.mxu3 %v408_v26  ;;  %v401_v30 = vmax.f32 %v346_v25, %v385_v27 }
  0xf2   : > { %v369_v31 = vpop.f32.mrf.mxu2 }
  0xf3   : > { %v370_v32 = vadd.f32 %v1181_v48, %v369_v31  ;;  %461 = vmatmul.f32.gmra.mxu1 %v401_v30 }
  0xf4   : > { %v348_v33 = vpop.f32.mrf.mxu0 }
  0xf5   : > { %v393_v36 = vmul.f32 0.1, %v370_v32  ;;  %v349_v37 = vadd.f32 %v1181_v48, %v348_v33 }
  0xf7   : > { %v409_v38 = vmax.f32 %v370_v32, %v393_v36  ;;  %v386_v39 = vmul.f32 0.1, %v349_v37 }
  0xf9   : > { %485 = vmatmul.f32.gmra.mxu3 %v409_v38  ;;  %v402_v44 = vmax.f32 %v349_v37, %v386_v39 }
  0xfa   : > { %v372_v45 = vpop.f32.mrf.mxu2 }
  0xfb   : > { %v373_v46 = vadd.f32 %v1181_v48, %v372_v45  ;;  %464 = vmatmul.f32.gmra.mxu1 %v402_v44 }
  0xfc   : > { %v351_v47 = vpop.f32.mrf.mxu0 }
  0xfd   : > { %v394_v49 = vmul.f32 0.1, %v373_v46  ;;  %v352_v50 = vadd.f32 %v1181_v48, %v351_v47 }
  0xff   : > { %v410_v51 = vmax.f32 %v373_v46, %v394_v49  ;;  %v387_v52 = vmul.f32 0.1, %v352_v50 }
 0x101   : > { %488 = vmatmul.f32.gmra.mxu3 %v410_v51  ;;  %v403_v53 = vmax.f32 %v352_v50, %v387_v52 }
 0x102   : > { %v375_v54 = vpop.f32.mrf.mxu2 }
 0x103   : > { %v376_v55 = vadd.f32 %v1181_v48, %v375_v54  ;;  %467 = vmatmul.f32.gmra.mxu1 %v403_v53 }
 0x104   : > { %v354_v56 = vpop.f32.mrf.mxu0 }
 0x105   : > { %v395_v57 = vmul.f32 0.1, %v376_v55  ;;  %v355_v58 = vadd.f32 %v1181_v48, %v354_v56 }
 0x107   : > { %v411_v59 = vmax.f32 %v376_v55, %v395_v57  ;;  %v388_v60 = vmul.f32 0.1, %v355_v58 }
 0x109   : > { %491 = vmatmul.f32.gmra.mxu3 %v411_v59  ;;  %v404_v61 = vmax.f32 %v355_v58, %v388_v60 }
 0x10a   : > { %v378_v62 = vpop.f32.mrf.mxu2 }
 0x10b   : > { %v379_v63 = vadd.f32 %v1181_v48, %v378_v62  ;;  %470 = vmatmul.f32.gmra.mxu1 %v404_v61 }
 0x10d   : > { %v396_v0 = vmul.f32 0.1, %v379_v63 }
 0x10f   : > { %v412_v1 = vmax.f32 %v379_v63, %v396_v0 }
 0x111   : > { %494 = vmatmul.f32.gmra.mxu3 %v412_v1 }
 0x150   : > { %v450_v3 = vpop.f32.mrf.mxu1 }
 0x151   : > { %v451_v4 = vadd.f32 %v1202_v2, %v450_v3 }
 0x153   : > { %v498_v5 = vadd.f32 %v451_v4, %v1118_v17 }
 0x155   : > { %v514_v6 = vmul.f32 0.1, %v498_v5 }
 0x157   : > { %v530_v7 = vmax.f32 %v498_v5, %v514_v6 }
 0x158   : > { %v453_v8 = vpop.f32.mrf.mxu1 }
 0x159   : > { %546 = vst [vmem:[%s1208_s12] sm:$0xff] %v530_v7  ;;  %v454_v48 = vadd.f32 %v1202_v2, %v453_v8 }
 0x15b   : > { %v499_v9 = vadd.f32 %v454_v48, %v1126_v19 }
 0x15c   : > { %v474_v10 = vpop.f32.mrf.mxu3 }
 0x15d   : > { %v475_v11 = vadd.f32 %v1202_v2, %v474_v10  ;;  %v515_v12 = vmul.f32 0.1, %v499_v9 }
 0x15f   : > { %v506_v17 = vadd.f32 %v475_v11, %v1115_v16  ;;  %v531_v13 = vmax.f32 %v499_v9, %v515_v12 }
 0x160   : > { %v456_v14 = vpop.f32.mrf.mxu1 }
 0x161   : > { %v522_v15 = vmul.f32 0.1, %v506_v17  ;;  %547 = vst [vmem:[%s1208_s12 + $0x8] sm:$0xff] %v531_v13  ;;  %v457_v24 = vadd.f32 %v1202_v2, %v456_v14 }
 0x163   : > { %v538_v25 = vmax.f32 %v506_v17, %v522_v15  ;;  %v500_v26 = vadd.f32 %v457_v24, %v1134_v21 }
 0x164   : > { %v477_v27 = vpop.f32.mrf.mxu3 }
 0x165   : > { %554 = vst [vmem:[%s1208_s12 + $0x40] sm:$0xff] %v538_v25  ;;  %v478_v19 = vadd.f32 %v1202_v2, %v477_v27  ;;  %v516_v30 = vmul.f32 0.1, %v500_v26 }
 0x167   : > { %v507_v31 = vadd.f32 %v478_v19, %v1123_v18  ;;  %v532_v16 = vmax.f32 %v500_v26, %v516_v30 }
 0x168   : > { %v459_v32 = vpop.f32.mrf.mxu1 }
 0x169   : > { %v523_v33 = vmul.f32 0.1, %v507_v31  ;;  %548 = vst [vmem:[%s1208_s12 + $0x10] sm:$0xff] %v532_v16  ;;  %v460_v36 = vadd.f32 %v1202_v2, %v459_v32 }
 0x16b   : > { %v539_v37 = vmax.f32 %v507_v31, %v523_v33  ;;  %v501_v38 = vadd.f32 %v460_v36, %v1142_v23 }
 0x16c   : > { %v480_v39 = vpop.f32.mrf.mxu3 }
 0x16d   : > { %555 = vst [vmem:[%s1208_s12 + $0x48] sm:$0xff] %v539_v37  ;;  %v481_v21 = vadd.f32 %v1202_v2, %v480_v39  ;;  %v517_v44 = vmul.f32 0.1, %v501_v38 }
 0x16f   : > { %v508_v45 = vadd.f32 %v481_v21, %v1131_v20  ;;  %v533_v18 = vmax.f32 %v501_v38, %v517_v44 }
 0x170   : > { %v462_v46 = vpop.f32.mrf.mxu1 }
 0x171   : > { %v524_v47 = vmul.f32 0.1, %v508_v45  ;;  %549 = vst [vmem:[%s1208_s12 + $0x18] sm:$0xff] %v533_v18  ;;  %v463_v49 = vadd.f32 %v1202_v2, %v462_v46 }
 0x173   : > { %v540_v50 = vmax.f32 %v508_v45, %v524_v47  ;;  %v502_v51 = vadd.f32 %v463_v49, %v1150_v29 }
 0x174   : > { %v483_v52 = vpop.f32.mrf.mxu3 }
 0x175   : > { %556 = vst [vmem:[%s1208_s12 + $0x50] sm:$0xff] %v540_v50  ;;  %v484_v23 = vadd.f32 %v1202_v2, %v483_v52  ;;  %v518_v53 = vmul.f32 0.1, %v502_v51 }
 0x177   : > { %v509_v54 = vadd.f32 %v484_v23, %v1139_v22  ;;  %v534_v20 = vmax.f32 %v502_v51, %v518_v53 }
 0x178   : > { %v465_v55 = vpop.f32.mrf.mxu1 }
 0x179   : > { %v525_v56 = vmul.f32 0.1, %v509_v54  ;;  %550 = vst [vmem:[%s1208_s12 + $0x20] sm:$0xff] %v534_v20  ;;  %v466_v57 = vadd.f32 %v1202_v2, %v465_v55 }
 0x17b   : > { %v541_v58 = vmax.f32 %v509_v54, %v525_v56  ;;  %v503_v59 = vadd.f32 %v466_v57, %v1158_v35 }
 0x17c   : > { %v486_v60 = vpop.f32.mrf.mxu3 }
 0x17d   : > { %557 = vst [vmem:[%s1208_s12 + $0x58] sm:$0xff] %v541_v58  ;;  %v487_v29 = vadd.f32 %v1202_v2, %v486_v60  ;;  %v519_v61 = vmul.f32 0.1, %v503_v59 }
 0x17f   : > { %v510_v62 = vadd.f32 %v487_v29, %v1147_v28  ;;  %v535_v22 = vmax.f32 %v503_v59, %v519_v61 }
 0x180   : > { %v468_v63 = vpop.f32.mrf.mxu1 }
 0x181   : > { %v526_v0 = vmul.f32 0.1, %v510_v62  ;;  %551 = vst [vmem:[%s1208_s12 + $0x28] sm:$0xff] %v535_v22  ;;  %v469_v1 = vadd.f32 %v1202_v2, %v468_v63 }
 0x183   : > { %v542_v3 = vmax.f32 %v510_v62, %v526_v0  ;;  %v504_v4 = vadd.f32 %v469_v1, %v1166_v41 }
 0x184   : > { %v489_v5 = vpop.f32.mrf.mxu3 }
 0x185   : > { %558 = vst [vmem:[%s1208_s12 + $0x60] sm:$0xff] %v542_v3  ;;  %v490_v35 = vadd.f32 %v1202_v2, %v489_v5  ;;  %v520_v6 = vmul.f32 0.1, %v504_v4 }
 0x187   : > { %v511_v7 = vadd.f32 %v490_v35, %v1155_v34  ;;  %v536_v28 = vmax.f32 %v504_v4, %v520_v6 }
 0x188   : > { %v471_v8 = vpop.f32.mrf.mxu1 }
 0x189   : > { %v527_v48 = vmul.f32 0.1, %v511_v7  ;;  %552 = vst [vmem:[%s1208_s12 + $0x30] sm:$0xff] %v536_v28  ;;  %v472_v9 = vadd.f32 %v1202_v2, %v471_v8 }
 0x18b   : > { %v543_v10 = vmax.f32 %v511_v7, %v527_v48  ;;  %v505_v11 = vadd.f32 %v472_v9, %v1174_v43 }
 0x18c   : > { %v492_v41 = vpop.f32.mrf.mxu3 }
 0x18d   : > { %559 = vst [vmem:[%s1208_s12 + $0x68] sm:$0xff] %v543_v10  ;;  %v493_v12 = vadd.f32 %v1202_v2, %v492_v41  ;;  %v521_v17 = vmul.f32 0.1, %v505_v11 }
 0x18f   : > { %v512_v13 = vadd.f32 %v493_v12, %v1163_v40  ;;  %v537_v34 = vmax.f32 %v505_v11, %v521_v17 }
 0x191   : > { %v528_v14 = vmul.f32 0.1, %v512_v13  ;;  %553 = vst [vmem:[%s1208_s12 + $0x38] sm:$0xff] %v537_v34 }
 0x193   : > { %v544_v15 = vmax.f32 %v512_v13, %v528_v14 }
 0x194   : > { %v495_v24 = vpop.f32.mrf.mxu3 }
 0x195   : > { %560 = vst [vmem:[%s1208_s12 + $0x70] sm:$0xff] %v544_v15  ;;  %v496_v43 = vadd.f32 %v1202_v2, %v495_v24 }
 0x197   : > { %v513_v25 = vadd.f32 %v496_v43, %v1171_v42 }
 0x199   : > { %v529_v40 = vmul.f32 0.1, %v513_v25 }
 0x19b   : > { %v545_v26 = vmax.f32 %v513_v25, %v529_v40 }
 0x19d   : > { %561 = vst [vmem:[%s1208_s12 + $0x78] sm:$0xff] %v545_v26 }
 0x19e   : > { %912 = shalt.err (!%p909_p10)
}
 0x19f   : > { %s961_s8 = smov 128   ;;  %s962_s9 = smov 8  }
 0x1a0   : > { %732 = dma.vmem_to_hbm [thread:$0]  (%p1065_p3), %s576_s6, 2048, %s578_s7, %s563_s22, %s961_s8, %s961_s8, %s962_s9  }
 0x1a1 PF: > { %s592_s12 = sand.u32 1, %s943_s18   ;;  %p1303_p12 = scmp.ge.s32.totalorder %s955_s21, 2 }
 0x1a2   : > { %s593_s13 = scalar_lea.sflag [#allocation4], %s592_s12 }
 0x1a3   : > { %p746_p13 = pnand %p1303_p12, %p1028_p6 }
 0x1a5   : > { %p747_p0 = pneg %p746_p13 }
 0x1a7   : > { %938 = dma.done.wait (%p747_p0), %s593_s13, 2048  }
 0x1a8   : > { %940 = vsyncadd (%p747_p0), %s593_s13, 4294965248  ;;  %p19_p5 = scmp.ge.s32.totalorder %s1055_s14, 4   ;;  %s1304_s18 = smov %s947_s19 }
 0x1a9   : > { %s1305_s19 = smov %s951_s20  ;;  %s1306_s20 = smov %s1071_s23 }
 0x1aa   : > { %s1307_s21 = smov %s1055_s14  ;;  %21 = sbr.rel (!%p19_p5) target bundleno = 6 (0x6), region = 93 }
 0x1af   :  { %599 = vsyncpa [#allocation3], 1 }
 0x1b0   :  { %601 = vsyncpa [#allocation3 + $0x1], 1 }
 0x1b1   :  { %602 = vsyncpa [#allocation6], 1 }
 0x1b2   :  { %603 = vsyncpa [#allocation4], 1 }
 0x1b3   :  { %605 = vsyncpa [#allocation4 + $0x1], 1 }

</bundles_post_ra>
